<compile_context>
chip_gen: v6e
topology: v6e:2x2x1
jax: 0.10.0
libtpu: 0.0.40
codegen_flags: <defaults>
</compile_context>

<pallas_src>
import functools

import jax
import jax.numpy as jnp
from jax import lax
from jax.experimental import pallas as pl
from jax.experimental.pallas import tpu as pltpu

_BIG = 1e30                              # sentinel, safe in f32 (2*_BIG finite)
_VMEM_LIMIT = 48 * 1024 * 1024           # safe on v7x (64 MiB phys); v5e/v6e may go higher
_FEATURE_VMEM_BUDGET = 36 * 1024 * 1024  # double-buffered feature tiles budget


def _triplet_loss_kernel(xa_ref, aux_a_ref, xb_ref, aux_b_ref, out_ref,
                         ap_sc, an_sc, *, margin):
    # xa_ref   : (TM, D)  anchor features (f32 or bf16)
    # aux_a_ref: (2, TM)  f32 rows: [ |x_i|^2 ; label_i ]   (pad label = NaN)
    # xb_ref   : (TN, D)  candidate features
    # aux_b_ref: (TN, 2)  f32 cols: [ |x_j|^2/2 , label_j ] (pad: +BIG, NaN)
    # out_ref  : (1, TM)  f32 per-anchor hinge loss (written at last j)
    # ap_sc/an_sc: (1, TM) f32 running max/min of (|x_j|^2/2 - <x_i,x_j>)
    j = pl.program_id(1)

    @pl.when(j == 0)
    def _():
        ap_sc[...] = jnp.full_like(ap_sc, -_BIG)
        an_sc[...] = jnp.full_like(an_sc, _BIG)

    # (TN, TM) gram tile on the MXU; contract the last (feature) dims of both
    # operands so no explicit transpose / XLU relayout is needed.
    gram = lax.dot_general(
        xb_ref[...], xa_ref[...],
        dimension_numbers=(((1,), (1,)), ((), ())),
        preferred_element_type=jnp.float32)                  # (TN, TM)

    half_sqb = aux_b_ref[:, 0:1]                             # (TN, 1)
    tb = aux_b_ref[:, 1:2]                                   # (TN, 1)
    ta = aux_a_ref[1:2, :]                                   # (1,  TM)

    # Half squared distance minus the anchor norm (constant along j):
    #   d^2/2 = |x_i|^2/2 + |x_j|^2/2 - <x_i, x_j>
    h = half_sqb - gram                                      # (TN, TM)

    # NaN padded labels never compare equal -> padded rows/cols self-exclude
    # from the positive mask; padded candidates carry h = +BIG so they also
    # self-exclude from the hardest-negative min. No validity row needed.
    same = tb == ta                                          # (TN, TM)

    # Hardest positive: max over same-label candidates (diagonal included,
    # matching the PyTorch reference). Reduce immediately so only one masked
    # (TN, TM) temporary is live at a time.
    ap_sc[...] = jnp.maximum(
        ap_sc[...],
        jnp.max(jnp.where(same, h, -_BIG), axis=0, keepdims=True))
    # Hardest negative: min over different-label candidates.
    an_sc[...] = jnp.minimum(
        an_sc[...],
        jnp.min(jnp.where(same, _BIG, h), axis=0, keepdims=True))

    @pl.when(j == pl.num_programs(1) - 1)
    def _():
        sqa = aux_a_ref[0:1, :]                              # (1, TM) |x_i|^2
        d_ap = jnp.sqrt(jnp.maximum(2.0 * ap_sc[...] + sqa, 1e-12))
        d_an = jnp.sqrt(jnp.maximum(2.0 * an_sc[...] + sqa, 1e-12))
        # MarginRankingLoss with y = 1: max(0, -(d_an - d_ap) + margin)
        out_ref[...] = jnp.maximum(d_ap - d_an + jnp.float32(margin), 0.0)


def triplet_loss(inputs, targets, margin=1.2, use_bf16_gram=False):
    """inputs: (N, D) float features, targets: (N,) int labels -> scalar f32.

    Labels are assumed integer-valued with |label| < 2^24 (exact in f32).
    """
    n, d = inputs.shape
    d_pad = int(pl.cdiv(d, 128)) * 128
    feat_dtype = jnp.bfloat16 if use_bf16_gram else jnp.float32
    feat_bytes = 2 if use_bf16_gram else 4

    # Tile choice (see header). 2 feature streams x 2 buffers x tile x d_pad.
    tile = 256
    while tile > 128 and 2 * 2 * tile * d_pad * feat_bytes > _FEATURE_VMEM_BUDGET:
        tile //= 2
    if n <= 2 * 128:
        tile = 128
    n_pad = int(pl.cdiv(n, tile)) * tile

    x = jnp.zeros((n_pad, d_pad), jnp.float32).at[:n, :d].set(
        inputs.astype(jnp.float32))
    sq = jnp.sum(x * x, axis=1)                              # (n_pad,), 0 on pads
    labels = jnp.full((n_pad,), jnp.nan, jnp.float32).at[:n].set(
        targets.astype(jnp.float32).reshape(n))
    half_sq_c = jnp.full((n_pad,), _BIG, jnp.float32).at[:n].set(0.5 * sq[:n])

    aux_anchor = jnp.stack([sq, labels], axis=0)             # (2, n_pad)
    aux_cand = jnp.stack([half_sq_c, labels], axis=1)        # (n_pad, 2)
    xf = x.astype(feat_dtype)

    grid = (n_pad // tile, n_pad // tile)

    per_anchor = pl.pallas_call(
        functools.partial(_triplet_loss_kernel, margin=float(margin)),
        out_shape=jax.ShapeDtypeStruct((1, n_pad), jnp.float32),
        grid_spec=pltpu.PrefetchScalarGridSpec(
            num_scalar_prefetch=0,
            grid=grid,
            in_specs=[
                pl.BlockSpec((tile, d_pad), lambda i, j: (i, 0)),  # anchor feats
                pl.BlockSpec((2, tile),     lambda i, j: (0, i)),  # anchor aux
                pl.BlockSpec((tile, d_pad), lambda i, j: (j, 0)),  # cand feats
                pl.BlockSpec((tile, 2),     lambda i, j: (j, 0)),  # cand aux
            ],
            out_specs=pl.BlockSpec((1, tile), lambda i, j: (0, i)),
            scratch_shapes=[pltpu.VMEM((1, tile), jnp.float32),
                            pltpu.VMEM((1, tile), jnp.float32)]),
        compiler_params=pltpu.CompilerParams(
            dimension_semantics=("parallel", "arbitrary"),
            vmem_limit_bytes=_VMEM_LIMIT),
    )(xf, aux_anchor, xf, aux_cand)

    # Drop padded anchors; finish the mean reduction in the wrapper.
    return jnp.mean(per_anchor[0, :n])


def _reference_triplet_loss(inputs, targets, margin=1.2):
    # Pure-JAX reference mirroring the PyTorch module, for sanity checking.
    x = inputs.astype(jnp.float32)
    sq = jnp.sum(x * x, axis=1, keepdims=True)
    dist = sq + sq.T - 2.0 * (x @ x.T)
    dist = jnp.sqrt(jnp.maximum(dist, 1e-12))
    t = targets.reshape(-1, 1)
    mask = t == t.T
    big = jnp.float32(1e30)
    dist_ap = jnp.max(jnp.where(mask, dist, -big), axis=1)
    dist_an = jnp.min(jnp.where(mask, big, dist), axis=1)
    return jnp.mean(jnp.maximum(dist_ap - dist_an + margin, 0.0))


if __name__ == "__main__":
    key = jax.random.PRNGKey(0)
    n, d = 8, 32
    inputs = jax.random.normal(key, (n, d), dtype=jnp.float32)
    # 4 classes, 2 samples each — every anchor has >=1 positive and >=1 negative.
    targets = jnp.array([0, 0, 1, 1, 2, 2, 3, 3], dtype=jnp.int32)

    loss = triplet_loss(inputs, targets, margin=1.2)
    jax.block_until_ready(loss)

    ref = _reference_triplet_loss(inputs, targets, margin=1.2)
    assert jnp.allclose(loss, ref, atol=1e-4, rtol=1e-4), (loss, ref)

    print("KERNEL_OK")
</pallas_src>

<mosaic_0001>
module attributes {stable_mosaic.version = 11 : i64} {
  func.func @_triplet_loss_kernel(%arg0: i32, %arg1: i32, %arg2: memref<128x128xf32, #tpu.memory_space<vmem>>, %arg3: memref<2x128xf32, #tpu.memory_space<vmem>>, %arg4: memref<128x128xf32, #tpu.memory_space<vmem>>, %arg5: memref<128x2xf32, #tpu.memory_space<vmem>>, %arg6: memref<1x128xf32, #tpu.memory_space<vmem>>, %arg7: memref<1x128xf32, #tpu.memory_space<vmem>>, %arg8: memref<1x128xf32, #tpu.memory_space<vmem>>) attributes {dimension_semantics = [#tpu.dimension_semantics<parallel>, #tpu.dimension_semantics<arbitrary>], iteration_bounds = array<i64: 1, 1>, scalar_prefetch = 0 : i64, scratch_operands = 2 : i64, tpu.core_type = #tpu.core_type<tc>, window_params = [{transform_indices = @transform_0, window_bounds = array<i64: 128, 128>}, {transform_indices = @transform_1, window_bounds = array<i64: 2, 128>}, {transform_indices = @transform_2, window_bounds = array<i64: 128, 128>}, {transform_indices = @transform_3, window_bounds = array<i64: 128, 2>}, {transform_indices = @transform_4, window_bounds = array<i64: 1, 128>}]} {
    %c0_i32 = arith.constant 0 : i32
    %0 = arith.cmpi eq, %arg1, %c0_i32 : i32
    %1 = arith.extui %0 : i1 to i32
    %c0_i32_0 = arith.constant 0 : i32
    %2 = arith.cmpi ne, %1, %c0_i32_0 : i32
    scf.if %2 {
      %cst_23 = arith.constant -1.000000e+30 : f32
      %31 = vector.broadcast %cst_23 : f32 to vector<1x128xf32>
      %c0_24 = arith.constant 0 : index
      %c0_25 = arith.constant 0 : index
      %32 = vector.load %arg7[%c0_24, %c0_25] : memref<1x128xf32, #tpu.memory_space<vmem>>, vector<1x128xf32>
      tpu.vector_store %arg7[%c0_24, %c0_25], %31 {strides = array<i32>} : memref<1x128xf32, #tpu.memory_space<vmem>>, vector<1x128xf32>,
      %cst_26 = arith.constant 1.000000e+30 : f32
      %33 = vector.broadcast %cst_26 : f32 to vector<1x128xf32>
      %c0_27 = arith.constant 0 : index
      %c0_28 = arith.constant 0 : index
      %34 = vector.load %arg8[%c0_27, %c0_28] : memref<1x128xf32, #tpu.memory_space<vmem>>, vector<1x128xf32>
      tpu.vector_store %arg8[%c0_27, %c0_28], %33 {strides = array<i32>} : memref<1x128xf32, #tpu.memory_space<vmem>>, vector<1x128xf32>,
    } else {
    }
    %c0 = arith.constant 0 : index
    %c0_1 = arith.constant 0 : index
    %3 = vector.load %arg4[%c0, %c0_1] : memref<128x128xf32, #tpu.memory_space<vmem>>, vector<128x128xf32>
    %c0_2 = arith.constant 0 : index
    %c0_3 = arith.constant 0 : index
    %4 = vector.load %arg2[%c0_2, %c0_3] : memref<128x128xf32, #tpu.memory_space<vmem>>, vector<128x128xf32>
    %cst = arith.constant dense<0.000000e+00> : vector<128x128xf32>
    %5 = tpu.matmul %3, %4, %cst {dimension_numbers = #tpu.dot_dimension_numbers<[1], [1], [0], [0], [0, 0, 1, 0], [], []>} : vector<128x128xf32>, vector<128x128xf32>, vector<128x128xf32> -> vector<128x128xf32>
    %c0_4 = arith.constant 0 : index
    %c0_5 = arith.constant 0 : index
    %6 = vector.load %arg5[%c0_4, %c0_5] : memref<128x2xf32, #tpu.memory_space<vmem>>, vector<128x1xf32>
    %c0_6 = arith.constant 0 : index
    %c1 = arith.constant 1 : index
    %7 = vector.load %arg5[%c0_6, %c1] : memref<128x2xf32, #tpu.memory_space<vmem>>, vector<128x1xf32>
    %c1_7 = arith.constant 1 : index
    %c0_8 = arith.constant 0 : index
    %8 = vector.load %arg3[%c1_7, %c0_8] : memref<2x128xf32, #tpu.memory_space<vmem>>, vector<1x128xf32>
    %9 = vector.broadcast %6 : vector<128x1xf32> to vector<128x128xf32>
    %10 = arith.subf %9, %5 : vector<128x128xf32>
    %11 = vector.broadcast %7 : vector<128x1xf32> to vector<128x128xf32>
    %12 = vector.broadcast %8 : vector<1x128xf32> to vector<128x128xf32>
    %13 = arith.cmpf oeq, %11, %12 : vector<128x128xf32>
    %c0_9 = arith.constant 0 : index
    %c0_10 = arith.constant 0 : index
    %14 = vector.load %arg7[%c0_9, %c0_10] : memref<1x128xf32, #tpu.memory_space<vmem>>, vector<1x128xf32>
    %cst_11 = arith.constant -1.000000e+30 : f32
    %15 = vector.broadcast %cst_11 : f32 to vector<128x128xf32>
    %16 = arith.select %13, %10, %15 : vector<128x128xi1>, vector<128x128xf32>
    %cst_12 = arith.constant dense<0xFF800000> : vector<128xf32>
    %17 = vector.multi_reduction <maximumf>, %16, %cst_12 [0] : vector<128x128xf32> to vector<128xf32>
    %18 = vector.shape_cast %17 : vector<128xf32> to vector<1x128xf32>
    %19 = arith.maximumf %14, %18 : vector<1x128xf32>
    %c0_13 = arith.constant 0 : index
    %c0_14 = arith.constant 0 : index
    %20 = vector.load %arg7[%c0_13, %c0_14] : memref<1x128xf32, #tpu.memory_space<vmem>>, vector<1x128xf32>
    tpu.vector_store %arg7[%c0_13, %c0_14], %19 {strides = array<i32>} : memref<1x128xf32, #tpu.memory_space<vmem>>, vector<1x128xf32>,
    %c0_15 = arith.constant 0 : index
    %c0_16 = arith.constant 0 : index
    %21 = vector.load %arg8[%c0_15, %c0_16] : memref<1x128xf32, #tpu.memory_space<vmem>>, vector<1x128xf32>
    %cst_17 = arith.constant 1.000000e+30 : f32
    %22 = vector.broadcast %cst_17 : f32 to vector<128x128xf32>
    %23 = arith.select %13, %22, %10 : vector<128x128xi1>, vector<128x128xf32>
    %cst_18 = arith.constant dense<0x7F800000> : vector<128xf32>
    %24 = vector.multi_reduction <minimumf>, %23, %cst_18 [0] : vector<128x128xf32> to vector<128xf32>
    %25 = vector.shape_cast %24 : vector<128xf32> to vector<1x128xf32>
    %26 = arith.minimumf %21, %25 : vector<1x128xf32>
    %c0_19 = arith.constant 0 : index
    %c0_20 = arith.constant 0 : index
    %27 = vector.load %arg8[%c0_19, %c0_20] : memref<1x128xf32, #tpu.memory_space<vmem>>, vector<1x128xf32>
    tpu.vector_store %arg8[%c0_19, %c0_20], %26 {strides = array<i32>} : memref<1x128xf32, #tpu.memory_space<vmem>>, vector<1x128xf32>,
    %c0_i32_21 = arith.constant 0 : i32
    %28 = arith.cmpi eq, %arg1, %c0_i32_21 : i32
    %29 = arith.extui %28 : i1 to i32
    %c0_i32_22 = arith.constant 0 : i32
    %30 = arith.cmpi ne, %29, %c0_i32_22 : i32
    scf.if %30 {
      %c0_23 = arith.constant 0 : index
      %c0_24 = arith.constant 0 : index
      %31 = vector.load %arg3[%c0_23, %c0_24] : memref<2x128xf32, #tpu.memory_space<vmem>>, vector<1x128xf32>
      %c0_25 = arith.constant 0 : index
      %c0_26 = arith.constant 0 : index
      %32 = vector.load %arg7[%c0_25, %c0_26] : memref<1x128xf32, #tpu.memory_space<vmem>>, vector<1x128xf32>
      %cst_27 = arith.constant 2.000000e+00 : f32
      %33 = vector.broadcast %cst_27 : f32 to vector<1x128xf32>
      %34 = arith.mulf %33, %32 : vector<1x128xf32>
      %35 = arith.addf %34, %31 : vector<1x128xf32>
      %cst_28 = arith.constant 9.99999996E-13 : f32
      %36 = vector.broadcast %cst_28 : f32 to vector<1x128xf32>
      %37 = arith.maximumf %35, %36 : vector<1x128xf32>
      %38 = math.sqrt %37 : vector<1x128xf32>
      %c0_29 = arith.constant 0 : index
      %c0_30 = arith.constant 0 : index
      %39 = vector.load %arg8[%c0_29, %c0_30] : memref<1x128xf32, #tpu.memory_space<vmem>>, vector<1x128xf32>
      %cst_31 = arith.constant 2.000000e+00 : f32
      %40 = vector.broadcast %cst_31 : f32 to vector<1x128xf32>
      %41 = arith.mulf %40, %39 : vector<1x128xf32>
      %42 = arith.addf %41, %31 : vector<1x128xf32>
      %cst_32 = arith.constant 9.99999996E-13 : f32
      %43 = vector.broadcast %cst_32 : f32 to vector<1x128xf32>
      %44 = arith.maximumf %42, %43 : vector<1x128xf32>
      %45 = math.sqrt %44 : vector<1x128xf32>
      %46 = arith.subf %38, %45 : vector<1x128xf32>
      %cst_33 = arith.constant 1.200000e+00 : f32
      %47 = vector.broadcast %cst_33 : f32 to vector<1x128xf32>
      %48 = arith.addf %46, %47 : vector<1x128xf32>
      %cst_34 = arith.constant 0.000000e+00 : f32
      %49 = vector.broadcast %cst_34 : f32 to vector<1x128xf32>
      %50 = arith.maximumf %48, %49 : vector<1x128xf32>
      %c0_35 = arith.constant 0 : index
      %c0_36 = arith.constant 0 : index
      %51 = vector.load %arg6[%c0_35, %c0_36] : memref<1x128xf32, #tpu.memory_space<vmem>>, vector<1x128xf32>
      tpu.vector_store %arg6[%c0_35, %c0_36], %50 {strides = array<i32>} : memref<1x128xf32, #tpu.memory_space<vmem>>, vector<1x128xf32>,
    } else {
    }
    return
  }
  func.func @transform_0(%arg0: i32, %arg1: i32) -> (i32, i32) {
    %c0_i32 = arith.constant 0 : i32
    %c0_i32_0 = arith.constant 0 : i32
    return %arg0, %c0_i32 : i32, i32
  }
  func.func @transform_1(%arg0: i32, %arg1: i32) -> (i32, i32) {
    %c0_i32 = arith.constant 0 : i32
    %c0_i32_0 = arith.constant 0 : i32
    return %c0_i32, %arg0 : i32, i32
  }
  func.func @transform_2(%arg0: i32, %arg1: i32) -> (i32, i32) {
    %c0_i32 = arith.constant 0 : i32
    %c0_i32_0 = arith.constant 0 : i32
    return %arg1, %c0_i32 : i32, i32
  }
  func.func @transform_3(%arg0: i32, %arg1: i32) -> (i32, i32) {
    %c0_i32 = arith.constant 0 : i32
    %c0_i32_0 = arith.constant 0 : i32
    return %arg1, %c0_i32 : i32, i32
  }
  func.func @transform_4(%arg0: i32, %arg1: i32) -> (i32, i32) {
    %c0_i32 = arith.constant 0 : i32
    %c0_i32_0 = arith.constant 0 : i32
    return %c0_i32, %arg0 : i32, i32
  }
}

</mosaic_0001>

<bundles_post_ra>
// kernel: tpu_custom_call.1
= control target key start
LH: loop header
LB: loop body
LE: loop exit
PB: predicated region body
PF: predicated region fallthrough
CT: control target
= control target key end

     0   :  { %9 = vsyncpa [#allocation5], 0  ;;  %s1034_s0 = inlined_call_operand.vmem [shape: f32[128,128], index: 0, kind: input, shape index: {}]   ;;  %s1035_s1 = inlined_call_operand.vmem [shape: f32[2,128], index: 1, kind: input, shape index: {}]   ;;  %s1036_s2 = inlined_call_operand.hbm [shape: f32[128,128], index: 2, kind: input, shape index: {}]   ;;  %s1037_s3 = inlined_call_operand.vmem [shape: f32[128,2], index: 3, kind: input, shape index: {}]   ;;  %s1038_s4 = inlined_call_operand.hbm [shape: f32[1,128], index: 4, kind: output, shape index: {}]  }
   0x1   :  { %10 = vsyncpa [#allocation6], 0  ;;  %s722_s15 = smov [#allocation4]  }
   0x2   :  { %s20_s16 = sshll.u32 %s722_s15, 4  ;;  %s21_s16 = int_to_ptr.vmem [resolvable:$true] %s20_s16 }
   0x3   :  { %s686_s17 = scalar_lea.vmem %s21_s16, 2048  ;;  %p691_p1 = scmp.lt.s32.totalorder %s21_s16, %s21_s16 }
   0x4   :  { %p687_p0 = scmp.ne.s32.totalorder %s21_s16, %s686_s17  ;;  %p692_p2 = scmp.lt.s32.totalorder %s686_s17, %s686_s17 }
   0x6   :  { %p693_p3 = por %p692_p2, %p691_p1 }
   0x8   :  { %p694_p4 = pnand %p693_p3, %p687_p0 }
   0xa   :  { %697 = shalt.err (!%p694_p4)
}
   0xb   :  { %s723_s18 = smov 128   ;;  %s724_s19 = smov 8  }
   0xc   :  { %26 = dma.hbm_to_vmem [thread:$0]  %s1036_s2, 2048, %s21_s16, [#allocation5], %s723_s18, %s723_s18, %s724_s19  }
   0xd   :  { %718 = dma.done.wait [#allocation5], 2048  }
   0xe   :  { %719 = vsyncadd [#allocation5], 4294965248  ;;  %v725_v0 = vmov 0   ;;  %v69_v1 = vld [vmem:[%s1034_s0 + $0x78] sm:$0xff]  ;;  %v68_v2 = vld [vmem:[%s1034_s0 + $0x70] sm:$0xff]  ;;  %v726_v20 = vmov 1  }
   0xf   :  { %667 = vset.pattern.permute.xlu1 %v725_v0  ;;  %666 = vset.pattern.permute.xlu0 %v725_v0  ;;  %v67_v3 = vld [vmem:[%s1034_s0 + $0x68] sm:$0xff]  ;;  %v217_v6 = vld [vmem:[%s1037_s3 + $0x10] sm:$0xff]  ;;  %v66_v7 = vld [vmem:[%s1034_s0 + $0x60] sm:$0xff]  ;;  %v727_v50 = vmov -1e+30  }
  0x10   :  { %570 = vmatprep.subr.mxu0 %v69_v1  ;;  %626 = vmatprep.subr.mxu1 %v69_v1  ;;  %v38_v4 = vld [vmem:[#allocation4] sm:$0xff]  ;;  %v218_v9 = vld [vmem:[%s1037_s3 + $0x18] sm:$0xff]  ;;  %v64_v14 = vld [vmem:[%s1034_s0 + $0x50] sm:$0xff]  ;;  %36 = vst [vmem:[#allocation2] sm:$0x1] %v727_v50 }
  0x11   :  { %571 = vmatpush3.xpose.msra.mxu0 %v69_v1  ;;  %642 = vmatpush3.xpose.msra.mxu1 %v69_v1  ;;  %v46_v5 = vld [vmem:[#allocation4 + $0x40] sm:$0xff]  ;;  %v65_v11 = vld [vmem:[%s1034_s0 + $0x58] sm:$0xff]  ;;  %v221_v16 = vld [vmem:[%s1037_s3 + $0x30] sm:$0xff]  ;;  %v728_v51 = vmov 1e+30  }
  0x12   :  { %572 = vmatprep.subr.mxu0 %v68_v2  ;;  %627 = vmatprep.subr.mxu1 %v68_v2  ;;  %v215_v8 = vld [vmem:[%s1037_s3] sm:$0xff]  ;;  %v216_v10 = vld [vmem:[%s1037_s3 + $0x8] sm:$0xff]  ;;  %v222_v15 = vld [vmem:[%s1037_s3 + $0x38] sm:$0xff]  ;;  %37 = vst [vmem:[#allocation3] sm:$0x1] %v728_v51 }
  0x13   :  { %602 = vmatprep.mubr.f32.mxu0 %v38_v4  ;;  %614 = vmatprep.mubr.f32.mxu1 %v46_v5  ;;  %v220_v12 = vld [vmem:[%s1037_s3 + $0x28] sm:$0xff]  ;;  %v219_v13 = vld [vmem:[%s1037_s3 + $0x20] sm:$0xff]  ;;  %v61_v22 = vld [vmem:[%s1034_s0 + $0x38] sm:$0xff] }
  0x14   :  { %244 = vperm.xlu1 %667, %v217_v6   ;;  %234 = vperm.xlu0 %666, %v215_v8   ;;  %v63_v17 = vld [vmem:[%s1034_s0 + $0x48] sm:$0xff]  ;;  %v62_v19 = vld [vmem:[%s1034_s0 + $0x40] sm:$0xff]  ;;  %v60_v23 = vld [vmem:[%s1034_s0 + $0x30] sm:$0xff] }
  0x15   :  { %573 = vmatpush3.xpose.msra.mxu0 %v68_v2  ;;  %643 = vmatpush3.xpose.msra.mxu1 %v68_v2  ;;  %v808_v18 = vld [vmem:[%s1037_s3 + $0x48] sm:$0xff]  ;;  %v58_v25 = vld [vmem:[%s1034_s0 + $0x20] sm:$0xff]  ;;  %v57_v27 = vld [vmem:[%s1034_s0 + $0x18] sm:$0xff] }
  0x16   :  { %574 = vmatprep.subr.mxu0 %v67_v3  ;;  %628 = vmatprep.subr.mxu1 %v67_v3  ;;  %v818_v21 = vld [vmem:[%s1037_s3 + $0x68] sm:$0xff]  ;;  %v223_v26 = vld [vmem:[%s1037_s3 + $0x40] sm:$0xff]  ;;  %v225_v28 = vld [vmem:[%s1037_s3 + $0x50] sm:$0xff] }
  0x17   :  { %v59_v24 = vld [vmem:[%s1034_s0 + $0x28] sm:$0xff]  ;;  %v56_v29 = vld [vmem:[%s1034_s0 + $0x10] sm:$0xff]  ;;  %v226_v30 = vld [vmem:[%s1037_s3 + $0x58] sm:$0xff] }
  0x18   :  { %249 = vperm.xlu1 %667, %v218_v9   ;;  %239 = vperm.xlu0 %666, %v216_v10   ;;  %v55_v31 = vld [vmem:[%s1034_s0 + $0x8] sm:$0xff]  ;;  %v54_v32 = vld [vmem:[%s1034_s0] sm:$0xff]  ;;  %v230_v34 = vld [vmem:[%s1037_s3 + $0x78] sm:$0xff] }
  0x19   :  { %575 = vmatpush3.xpose.msra.mxu0 %v67_v3  ;;  %644 = vmatpush3.xpose.msra.mxu1 %v67_v3  ;;  %v227_v33 = vld [vmem:[%s1037_s3 + $0x60] sm:$0xff]  ;;  %v39_v35 = vld [vmem:[#allocation4 + $0x8] sm:$0xff]  ;;  %v40_v37 = vld [vmem:[#allocation4 + $0x10] sm:$0xff] }
  0x1a   :  { %576 = vmatprep.subr.mxu0 %v66_v7  ;;  %629 = vmatprep.subr.mxu1 %v66_v7  ;;  %v47_v36 = vld [vmem:[#allocation4 + $0x48] sm:$0xff]  ;;  %v48_v38 = vld [vmem:[#allocation4 + $0x50] sm:$0xff]  ;;  %v41_v39 = vld [vmem:[#allocation4 + $0x18] sm:$0xff] }
  0x1b   :  { %v49_v40 = vld [vmem:[#allocation4 + $0x58] sm:$0xff]  ;;  %v42_v41 = vld [vmem:[#allocation4 + $0x20] sm:$0xff]  ;;  %v43_v43 = vld [vmem:[#allocation4 + $0x28] sm:$0xff] }
  0x1c   :  { %259 = vperm.xlu1 %667, %v220_v12   ;;  %254 = vperm.xlu0 %666, %v219_v13   ;;  %v50_v42 = vld [vmem:[#allocation4 + $0x60] sm:$0xff]  ;;  %v51_v44 = vld [vmem:[#allocation4 + $0x68] sm:$0xff]  ;;  %v44_v45 = vld [vmem:[#allocation4 + $0x30] sm:$0xff] }
  0x1d   :  { %577 = vmatpush3.xpose.msra.mxu0 %v66_v7  ;;  %645 = vmatpush3.xpose.msra.mxu1 %v66_v7  ;;  %v52_v46 = vld [vmem:[#allocation4 + $0x70] sm:$0xff]  ;;  %v45_v48 = vld [vmem:[#allocation4 + $0x38] sm:$0xff] }
  0x1e   :  { %578 = vmatprep.subr.mxu0 %v65_v11  ;;  %630 = vmatprep.subr.mxu1 %v65_v11  ;;  %v229_v47 = vld [vmem:[%s1037_s3 + $0x70] sm:$0xff]  ;;  %v53_v49 = vld [vmem:[#allocation4 + $0x78] sm:$0xff] }
  0x20   :  { %269 = vperm.xlu1 %667, %v222_v15   ;;  %264 = vperm.xlu0 %666, %v221_v16  }
  0x21   :  { %579 = vmatpush3.xpose.msra.mxu0 %v65_v11  ;;  %646 = vmatpush3.xpose.msra.mxu1 %v65_v11 }
  0x22   :  { %580 = vmatprep.subr.mxu0 %v64_v14  ;;  %631 = vmatprep.subr.mxu1 %v64_v14 }
  0x24   :  { %668 = vset.pattern.permute.xlu1 %v726_v20  ;;  %279 = vperm.xlu0 %666, %v808_v18  }
  0x25   :  { %581 = vmatpush3.xpose.msra.mxu0 %v64_v14  ;;  %647 = vmatpush3.xpose.msra.mxu1 %v64_v14 }
  0x26   :  { %582 = vmatprep.subr.mxu0 %v63_v17  ;;  %632 = vmatprep.subr.mxu1 %v63_v17 }
  0x27   :  { %333 = vperm.xlu1 %668, %v216_v10  }
  0x28   :  { %299 = vperm.xlu0 %666, %v818_v21  }
  0x29   :  { %583 = vmatpush3.xpose.msra.mxu0 %v63_v17  ;;  %648 = vmatpush3.xpose.msra.mxu1 %v63_v17 }
  0x2a   :  { %584 = vmatprep.subr.mxu0 %v62_v19  ;;  %633 = vmatprep.subr.mxu1 %v62_v19 }
  0x2b   :  { %337 = vperm.xlu1 %668, %v217_v6  }
  0x2c   :  { %672 = vset.pattern.permute.xlu0 %v726_v20 }
  0x2d   :  { %585 = vmatpush3.xpose.msra.mxu0 %v62_v19  ;;  %649 = vmatpush3.xpose.msra.mxu1 %v62_v19 }
  0x2e   :  { %586 = vmatprep.subr.mxu0 %v61_v22  ;;  %634 = vmatprep.subr.mxu1 %v61_v22 }
  0x2f   :  { %345 = vperm.xlu1 %668, %v219_v13   ;;  %329 = vperm.xlu0 %672, %v215_v8  }
  0x31   :  { %587 = vmatpush3.xpose.msra.mxu0 %v61_v22  ;;  %650 = vmatpush3.xpose.msra.mxu1 %v61_v22 }
  0x32   :  { %588 = vmatprep.subr.mxu0 %v60_v23  ;;  %635 = vmatprep.subr.mxu1 %v60_v23 }
  0x33   :  { %353 = vperm.xlu1 %668, %v221_v16   ;;  %341 = vperm.xlu0 %672, %v218_v9  }
  0x35   :  { %589 = vmatpush3.xpose.msra.mxu0 %v60_v23  ;;  %651 = vmatpush3.xpose.msra.mxu1 %v60_v23 }
  0x36   :  { %590 = vmatprep.subr.mxu0 %v59_v24  ;;  %636 = vmatprep.subr.mxu1 %v59_v24 }
  0x37   :  { %669 = vset.pattern.permute.xlu1 %v725_v0  ;;  %349 = vperm.xlu0 %672, %v220_v12  }
  0x38   :  { %274 = vperm.xlu1 %669, %v223_v26  }
  0x39   :  { %591 = vmatpush3.xpose.msra.mxu0 %v59_v24  ;;  %652 = vmatpush3.xpose.msra.mxu1 %v59_v24 }
  0x3a   :  { %592 = vmatprep.subr.mxu0 %v58_v25  ;;  %637 = vmatprep.subr.mxu1 %v58_v25 }
  0x3b   :  { %357 = vperm.xlu0 %672, %v222_v15  }
  0x3c   :  { %284 = vperm.xlu1 %669, %v225_v28  }
  0x3d   :  { %593 = vmatpush3.xpose.msra.mxu0 %v58_v25  ;;  %653 = vmatpush3.xpose.msra.mxu1 %v58_v25 }
  0x3e   :  { %594 = vmatprep.subr.mxu0 %v57_v27  ;;  %638 = vmatprep.subr.mxu1 %v57_v27 }
  0x3f   :  { %361 = vperm.xlu0 %672, %v223_v26  }
  0x40   :  { %289 = vperm.xlu1 %669, %v226_v30  }
  0x41   :  { %595 = vmatpush3.xpose.msra.mxu0 %v57_v27  ;;  %654 = vmatpush3.xpose.msra.mxu1 %v57_v27 }
  0x42   :  { %596 = vmatprep.subr.mxu0 %v56_v29  ;;  %639 = vmatprep.subr.mxu1 %v56_v29 }
  0x43   :  { %373 = vperm.xlu0 %672, %v226_v30  }
  0x44   :  { %670 = vset.pattern.permute.xlu1 %v726_v20 }
  0x45   :  { %597 = vmatpush3.xpose.msra.mxu0 %v56_v29  ;;  %655 = vmatpush3.xpose.msra.mxu1 %v56_v29 }
  0x46   :  { %598 = vmatprep.subr.mxu0 %v55_v31  ;;  %640 = vmatprep.subr.mxu1 %v55_v31 }
  0x47   :  { %365 = vperm.xlu1 %670, %v808_v18   ;;  %377 = vperm.xlu0 %672, %v227_v33   ;;  %v903_v18 = vld [vmem:[%s1035_s1 + $0x1] ss:$0 sm:$0xff] }
  0x49   :  { %599 = vmatpush3.xpose.msra.mxu0 %v55_v31  ;;  %656 = vmatpush3.xpose.msra.mxu1 %v55_v31 }
  0x4a   :  { %600 = vmatprep.subr.mxu0 %v54_v32  ;;  %641 = vmatprep.subr.mxu1 %v54_v32 }
  0x4b   :  { %369 = vperm.xlu1 %670, %v225_v28   ;;  %389 = vperm.xlu0 %672, %v230_v34  }
  0x4d   :  { %601 = vmatpush3.xpose.msra.mxu0 %v54_v32  ;;  %657 = vmatpush3.xpose.msra.mxu1 %v54_v32 }
  0x4f   :  { %671 = vset.pattern.permute.xlu1 %v725_v0 }
  0x50   :  { %603 = vmatmul.mubr.f32.vlgmr.msra.gmra.mxu0 %v39_v35  ;;  %615 = vmatmul.mubr.f32.vlgmr.msra.gmra.mxu1 %v47_v36 }
  0x51   :  { %605 = vmatprep.mubr.f32.mxu0 %v40_v37  ;;  %617 = vmatprep.mubr.f32.mxu1 %v48_v38 }
  0x52   :  { %294 = vperm.xlu1 %671, %v227_v33  }
  0x54   :  { %606 = vmatmul.mubr.f32.gmra.mxu0 %v41_v39  ;;  %618 = vmatmul.mubr.f32.gmra.mxu1 %v49_v40 }
  0x55   :  { %608 = vmatprep.mubr.f32.mxu0 %v42_v41  ;;  %620 = vmatprep.mubr.f32.mxu1 %v50_v42 }
  0x56   :  { %304 = vperm.xlu1 %671, %v229_v47  }
  0x58   :  { %609 = vmatmul.mubr.f32.gmra.mxu0 %v43_v43  ;;  %621 = vmatmul.mubr.f32.gmra.mxu1 %v51_v44 }
  0x59   :  { %611 = vmatprep.mubr.f32.mxu0 %v44_v45  ;;  %623 = vmatprep.mubr.f32.mxu1 %v52_v46 }
  0x5a   :  { %309 = vperm.xlu1 %671, %v230_v34  }
  0x5c   :  { %612 = vmatmul.mubr.f32.gmra.mxu0 %v45_v48  ;;  %624 = vmatmul.mubr.f32.gmra.mxu1 %v53_v49 }
  0x5e   :  { %673 = vset.pattern.permute.xlu1 %v726_v20 }
  0x5f   :  { %381 = vperm.xlu1 %673, %v818_v21  }
  0x63   :  { %385 = vperm.xlu1 %673, %v229_v47  }
  0x8f   :  { %v870_v52 = vpop.permute.xlu1 %244  ;;  %v235_v55 = vpop.permute.xlu0 %234 }
  0x93   :  { %v250_v53 = vpop.permute.xlu1 %249  ;;  %v240_v57 = vpop.permute.xlu0 %239 }
  0x97   :  { %v872_v54 = vpop.permute.xlu1 %259  ;;  %v876_v59 = vpop.permute.xlu0 %254 }
  0x9b   :  { %v874_v56 = vpop.permute.xlu1 %269  ;;  %v880_v61 = vpop.permute.xlu0 %264 }
  0x9f   :  { %v280_v63 = vpop.permute.xlu0 %279 }
  0xa2   :  { %v334_v58 = vpop.permute.xlu1 %333 }
  0xa3   :  { %v886_v2 = vpop.permute.xlu0 %299  ;;  %vm397_vm0 = vcmp.eq.f32.partialorder %v334_v58, %v903_v18 }
  0xa6   :  { %v878_v60 = vpop.permute.xlu1 %337 }
  0xa7   :  { %vm398_vm2 = vcmp.eq.f32.partialorder %v878_v60, %v903_v18 }
  0xaa   :  { %v882_v62 = vpop.permute.xlu1 %345  ;;  %v330_v4 = vpop.permute.xlu0 %329 }
  0xab   :  { %vm400_vm1 = vcmp.eq.f32.partialorder %v882_v62, %v903_v18  ;;  %vm396_vm3 = vcmp.eq.f32.partialorder %v330_v4, %v903_v18 }
  0xae   :  { %v884_v0 = vpop.permute.xlu1 %353  ;;  %v342_v6 = vpop.permute.xlu0 %341 }
  0xaf   :  { %vm399_vm4 = vcmp.eq.f32.partialorder %v342_v6, %v903_v18  ;;  %vm402_vm12 = vcmp.eq.f32.partialorder %v884_v0, %v903_v18 }
  0xb2   :  { %v888_v8 = vpop.permute.xlu0 %349 }
  0xb3   :  { %v275_v1 = vpop.permute.xlu1 %274  ;;  %vm401_vm5 = vcmp.eq.f32.partialorder %v888_v8, %v903_v18 }
  0xb6   :  { %v892_v10 = vpop.permute.xlu0 %357 }
  0xb7   :  { %v285_v3 = vpop.permute.xlu1 %284  ;;  %vm403_vm6 = vcmp.eq.f32.partialorder %v892_v10, %v903_v18 }
  0xba   :  { %v362_v12 = vpop.permute.xlu0 %361 }
  0xbb   :  { %v290_v5 = vpop.permute.xlu1 %289  ;;  %vm404_vm7 = vcmp.eq.f32.partialorder %v362_v12, %v903_v18 }
  0xbe   :  { %v374_v14 = vpop.permute.xlu0 %373 }
  0xbf   :  { %vm407_vm8 = vcmp.eq.f32.partialorder %v374_v14, %v903_v18 }
  0xc2   :  { %v366_v7 = vpop.permute.xlu1 %365  ;;  %v905_v21 = vpop.permute.xlu0 %377 }
  0xc3   :  { %vm405_vm9 = vcmp.eq.f32.partialorder %v366_v7, %v903_v18  ;;  %vm408_vm13 = vcmp.eq.f32.partialorder %v905_v21, %v903_v18 }
  0xc6   :  { %v890_v9 = vpop.permute.xlu1 %369  ;;  %v935_v39 = vpop.permute.xlu0 %389 }
  0xc7   :  { %vm406_vm10 = vcmp.eq.f32.partialorder %v890_v9, %v903_v18  ;;  %vm411_vm15 = vcmp.eq.f32.partialorder %v935_v39, %v903_v18 }
  0xcd   :  { %v894_v11 = vpop.permute.xlu1 %294 }
  0xd1   :  { %v896_v13 = vpop.permute.xlu1 %304 }
  0xd5   :  { %v898_v15 = vpop.permute.xlu1 %309 }
  0xda   :  { %v907_v22 = vpop.permute.xlu1 %381 }
  0xdb   :  { %vm409_vm11 = vcmp.eq.f32.partialorder %v907_v22, %v903_v18 }
  0xde   :  { %v927_v32 = vpop.permute.xlu1 %385 }
  0xdf   :  { %vm410_vm14 = vcmp.eq.f32.partialorder %v927_v32, %v903_v18  ;;  %v412_v18 = vld [vmem:[#allocation2] sm:$0x1] }
 0x110   :  { %v604_v16 = vpop.f32.mrf.mxu0  ;;  %v616_v17 = vpop.f32.mrf.mxu1 }
 0x111   :  { %v313_v23 = vsub.f32 %v240_v57, %v604_v16  ;;  %v321_v24 = vsub.f32 %v280_v63, %v616_v17 }
 0x112   :  { %v136_v19 = vpop.f32.mrf.mxu0  ;;  %v176_v20 = vpop.f32.mrf.mxu1 }
 0x113   :  { %v312_v27 = vsub.f32 %v235_v55, %v136_v19  ;;  %v320_v28 = vsub.f32 %v275_v1, %v176_v20  ;;  %v414_v33 = vsel %vm397_vm0, %v313_v23, -1e+30  ;;  %v454_v34 = vsel %vm397_vm0, 1e+30, %v313_v23 }
 0x114   :  { %v607_v25 = vpop.f32.mrf.mxu0  ;;  %v619_v26 = vpop.f32.mrf.mxu1  ;;  %v422_v35 = vsel %vm405_vm9, %v321_v24, -1e+30  ;;  %v462_v40 = vsel %vm405_vm9, 1e+30, %v321_v24 }
 0x115   :  { %v315_v29 = vsub.f32 %v250_v53, %v607_v25  ;;  %v323_v36 = vsub.f32 %v290_v5, %v619_v26  ;;  %v413_v41 = vsel %vm396_vm3, %v312_v27, -1e+30  ;;  %v453_v42 = vsel %vm396_vm3, 1e+30, %v312_v27 }
 0x116   :  { %v146_v30 = vpop.f32.mrf.mxu0  ;;  %v186_v31 = vpop.f32.mrf.mxu1  ;;  %v421_v44 = vsel %vm404_vm7, %v320_v28, -1e+30  ;;  %v461_v45 = vsel %vm404_vm7, 1e+30, %v320_v28 }
 0x117   :  { %v416_v46 = vsel %vm399_vm4, %v315_v29, -1e+30  ;;  %v314_v47 = vsub.f32 %v870_v52, %v146_v30  ;;  %v456_v50 = vsel %vm399_vm4, 1e+30, %v315_v29  ;;  %v322_v51 = vsub.f32 %v285_v3, %v186_v31 }
 0x118   :  { %v610_v37 = vpop.f32.mrf.mxu0  ;;  %v622_v38 = vpop.f32.mrf.mxu1  ;;  %v424_v52 = vsel %vm407_vm8, %v323_v36, -1e+30  ;;  %v464_v55 = vsel %vm407_vm8, 1e+30, %v323_v36 }
 0x119   :  { %v317_v43 = vsub.f32 %v872_v54, %v610_v37  ;;  %v325_v58 = vsub.f32 %v886_v2, %v622_v38  ;;  %v415_v2 = vsel %vm398_vm2, %v314_v47, -1e+30  ;;  %v455_v6 = vsel %vm398_vm2, 1e+30, %v314_v47 }
 0x11a   :  { %v156_v48 = vpop.f32.mrf.mxu0  ;;  %v196_v49 = vpop.f32.mrf.mxu1  ;;  %v423_v14 = vsel %vm406_vm10, %v322_v51, -1e+30  ;;  %v463_v62 = vsel %vm406_vm10, 1e+30, %v322_v51 }
 0x11b   :  { %v418_v53 = vsel %vm401_vm5, %v317_v43, -1e+30  ;;  %v316_v54 = vsub.f32 %v876_v59, %v156_v48  ;;  %v458_v57 = vsel %vm401_vm5, 1e+30, %v317_v43  ;;  %v426_v60 = vsel %vm409_vm11, %v325_v58, -1e+30 }
 0x11c   :  { %v613_v63 = vpop.f32.mrf.mxu0  ;;  %v625_v1 = vpop.f32.mrf.mxu1  ;;  %v430_v59 = vmax.f32 %v414_v33, %v418_v53  ;;  %v470_v17 = vmin.f32 %v454_v34, %v458_v57  ;;  %v466_v19 = vsel %vm409_vm11, 1e+30, %v325_v58  ;;  %v324_v20 = vsub.f32 %v894_v11, %v196_v49 }
 0x11d   :  { %v417_v3 = vsel %vm400_vm1, %v316_v54, -1e+30  ;;  %v457_v4 = vsel %vm400_vm1, 1e+30, %v316_v54  ;;  %v319_v5 = vsub.f32 %v874_v56, %v613_v63  ;;  %v327_v28 = vsub.f32 %v898_v15, %v625_v1 }
 0x11e   :  { %v429_v7 = vmax.f32 %v413_v41, %v417_v3  ;;  %v469_v8 = vmin.f32 %v453_v42, %v457_v4  ;;  %v166_v12 = vpop.f32.mrf.mxu0  ;;  %v206_v23 = vpop.f32.mrf.mxu1  ;;  %v434_v9 = vmax.f32 %v430_v59, %v422_v35  ;;  %v474_v33 = vmin.f32 %v470_v17, %v462_v40 }
 0x11f   :  { %v420_v56 = vsel %vm403_vm6, %v319_v5, -1e+30  ;;  %v318_v16 = vsub.f32 %v880_v61, %v166_v12  ;;  %v460_v26 = vsel %vm403_vm6, 1e+30, %v319_v5  ;;  %v326_v31 = vsub.f32 %v896_v13, %v206_v23  ;;  %v452_v5 = vld [vmem:[#allocation3] sm:$0x1] }
 0x120   :  { %v433_v24 = vmax.f32 %v429_v7, %v421_v44  ;;  %v432_v25 = vmax.f32 %v416_v46, %v420_v56  ;;  %v473_v61 = vmin.f32 %v469_v8, %v461_v45  ;;  %v472_v27 = vmin.f32 %v456_v50, %v460_v26  ;;  %v495_v8 = vld [vmem:[%s1035_s1] sm:$0x1]  ;;  %s729_s1 = smov [#allocation7]  }
 0x121   :  { %v419_v29 = vsel %vm402_vm12, %v318_v16, -1e+30  ;;  %v459_v11 = vsel %vm402_vm12, 1e+30, %v318_v16  ;;  %v425_v10 = vsel %vm408_vm13, %v324_v20, -1e+30  ;;  %v438_v15 = vmax.f32 %v434_v9, %v426_v60 }
 0x122   :  { %v436_v22 = vmax.f32 %v432_v25, %v424_v52  ;;  %v431_v30 = vmax.f32 %v415_v2, %v419_v29  ;;  %v476_v34 = vmin.f32 %v472_v27, %v464_v55  ;;  %v471_v35 = vmin.f32 %v455_v6, %v459_v11  ;;  %s528_s7 = sshll.u32 %s729_s1, 4  ;;  %s529_s7 = int_to_ptr.vmem [resolvable:$true] %s528_s7 }
 0x123   :  { %v437_v36 = vmax.f32 %v433_v24, %v425_v10  ;;  %v465_v37 = vsel %vm408_vm13, 1e+30, %v324_v20  ;;  %v428_v0 = vsel %vm411_vm15, %v327_v28, -1e+30  ;;  %v427_v13 = vsel %vm410_vm14, %v326_v31, -1e+30  ;;  %p703_p6 = scmp.lt.s32.totalorder %s529_s7, %s529_s7 }
 0x124   :  { %v435_v38 = vmax.f32 %v431_v30, %v423_v14  ;;  %v477_v41 = vmin.f32 %v473_v61, %v465_v37  ;;  %v475_v40 = vmin.f32 %v471_v35, %v463_v62  ;;  %v440_v42 = vmax.f32 %v436_v22, %v428_v0  ;;  %s698_s8 = scalar_lea.vmem %s529_s7, 16  ;;  %s702_s9 = scalar_lea.vmem %s529_s7, 32 }
 0x125   :  { %v468_v43 = vsel %vm411_vm15, 1e+30, %v327_v28  ;;  %v467_v21 = vsel %vm410_vm14, 1e+30, %v326_v31  ;;  %v478_v45 = vmin.f32 %v474_v33, %v466_v19  ;;  %v441_v48 = vmax.f32 %v437_v36, %v438_v15  ;;  %p699_p5 = scmp.ne.s32.totalorder %s529_s7, %s698_s8  ;;  %p704_p7 = scmp.lt.s32.totalorder %s702_s9, %s698_s8 }
 0x126   :  { %v439_v44 = vmax.f32 %v435_v38, %v427_v13  ;;  %v480_v46 = vmin.f32 %v476_v34, %v468_v43  ;;  %v479_v47 = vmin.f32 %v475_v40, %v467_v21 }
 0x127   :  { %v481_v50 = vmin.f32 %v477_v41, %v478_v45  ;;  %p705_p8 = por %p704_p7, %p703_p6 }
 0x128   :  { %v442_v49 = vmax.f32 %v439_v44, %v440_v42  ;;  %v482_v51 = vmin.f32 %v479_v47, %v480_v46 }
 0x129   :  { %p706_p9 = pnand %p705_p8, %p699_p5 }
 0x12a   :  { %v443_v53 = vmax.f32 %v441_v48, %v442_v49  ;;  %v483_v54 = vmin.f32 %v481_v50, %v482_v51 }
 0x12c   :  { %v444_v52 = vrot.slane %v443_v53, 4  ;;  %v484_v55 = vrot.slane %v483_v54, 4 }
 0x12e   :  { %v445_v57 = vmax.f32 %v443_v53, %v444_v52  ;;  %v485_v58 = vmin.f32 %v483_v54, %v484_v55 }
 0x130   :  { %v446_v39 = vrot.slane %v445_v57, 2  ;;  %v486_v63 = vrot.slane %v485_v58, 2 }
 0x132   :  { %v447_v1 = vmax.f32 %v445_v57, %v446_v39  ;;  %v487_v59 = vmin.f32 %v485_v58, %v486_v63 }
 0x134   :  { %v448_v3 = vrot.slane %v447_v1, 1  ;;  %v488_v32 = vrot.slane %v487_v59, 1 }
 0x136   :  { %v449_v4 = vmax.f32 %v447_v1, %v448_v3  ;;  %v489_v2 = vmin.f32 %v487_v59, %v488_v32 }
 0x138   :  { %v450_v6 = vmax.f32 %v412_v18, %v449_v4  ;;  %v490_v7 = vmin.f32 %v452_v5, %v489_v2 }
 0x13a   :  { %451 = vst [vmem:[#allocation2] sm:$0x1] %v450_v6  ;;  %491 = vst [vmem:[#allocation3] sm:$0x1] %v490_v7 }
 0x141   :  { %v496_v12 = vld [vmem:[#allocation2] sm:$0x1]  ;;  %v507_v62 = vld [vmem:[#allocation3] sm:$0x1] }
 0x142   :  { %v497_v14 = vmul.f32 2.0, %v496_v12  ;;  %v508_v56 = vmul.f32 2.0, %v507_v62 }
 0x144   :  { %v498_v16 = vadd.f32 %v497_v14, %v495_v8  ;;  %v509_v17 = vadd.f32 %v508_v56, %v495_v8 }
 0x146   :  { %v499_v60 = vmax.f32 %v498_v16, 1e-12  ;;  %v510_v19 = vmax.f32 %v509_v17, 1e-12 }
 0x148   :  { %674 = vrsqrt.f32 %v499_v60  ;;  %vm502_vm0 = vcmp.eq.f32.partialorder %v499_v60, inf  ;;  %v505_v24 = vand.u32 2147483648, %v499_v60  ;;  %vm504_vm1 = vcmp.eq.f32.partialorder %v499_v60, 0.0 }
 0x149   :  { %676 = vrsqrt.f32 %v510_v19  ;;  %vm513_vm2 = vcmp.eq.f32.partialorder %v510_v19, inf  ;;  %v516_v61 = vand.u32 2147483648, %v510_v19  ;;  %vm515_vm3 = vcmp.eq.f32.partialorder %v510_v19, 0.0 }
 0x155   :  { %v675_v20 = vpop.eup %674 }
 0x156   :  { %v677_v23 = vpop.eup %676  ;;  %v501_v9 = vmul.f32 %v675_v20, %v499_v60 }
 0x157   :  { %v512_v25 = vmul.f32 %v677_v23, %v510_v19 }
 0x158   :  { %v503_v26 = vsel %vm502_vm0, %v499_v60, %v501_v9 }
 0x159   :  { %v506_v27 = vsel %vm504_vm1, %v505_v24, %v503_v26  ;;  %v514_v28 = vsel %vm513_vm2, %v510_v19, %v512_v25 }
 0x15a   :  { %v517_v29 = vsel %vm515_vm3, %v516_v61, %v514_v28 }
 0x15b   :  { %v518_v22 = vsub.f32 %v506_v27, %v517_v29 }
 0x15d   :  { %v519_v30 = vadd.f32 1.2, %v518_v22 }
 0x15f   :  { %v520_v11 = vmax.f32 %v519_v30, 0.0 }
 0x161   :  { %521 = vst [vmem:[#allocation7] sm:$0x1] %v520_v11 }
 0x162   :  { %709 = shalt.err (!%p706_p9)
}
 0x163   :  { %531 = dma.vmem_to_hbm [thread:$0]  %s529_s7, 16, %s1038_s4, [#allocation6]  }
 0x164   :  { %720 = dma.done.wait [#allocation6], 16  }
 0x165   :  { %721 = vsyncadd [#allocation6], 4294967280 }
 0x166   :  { %535 = vsyncpa [#allocation5], 1 }
 0x167   :  { %536 = vsyncpa [#allocation6], 1 }

</bundles_post_ra>
